<compile_context>
chip_gen: v7x
topology: tpu7x:2x2x1
jax: 0.10.0
libtpu: 0.0.40
codegen_flags: <defaults>
</compile_context>

<pallas_src>
import math
import functools

import jax
import jax.numpy as jnp
from jax import lax
from jax.experimental import pallas as pl
from jax.experimental.pallas import tpu as pltpu


# ---------------------------------------------------------------------------
# Kernel bodies
# ---------------------------------------------------------------------------

def _attention_block(q, k, v, *, inv_sqrt_dk, mxu_bf16, exact_div):
    """Shared per-tile attention math. q:(bb,tq,dk) k:(bb,Lk,dk) v:(bb,Lk,dv)."""
    if mxu_bf16 and q.dtype == jnp.float32:
        q = q.astype(jnp.bfloat16)
        k = k.astype(jnp.bfloat16)
        v = v.astype(jnp.bfloat16)

    # scores = Q @ K^T without materializing a transpose: contract the last
    # (d_k) dim of both operands, batch over the leading dim.  f32 accumulate.
    s = lax.dot_general(
        q, k,
        dimension_numbers=(((2,), (2,)), ((0,), (0,))),
        preferred_element_type=jnp.float32,
    )  # (bb, tq, Lk)
    s = s * jnp.float32(inv_sqrt_dk)  # scale the f32 scores (same order as torch)

    # Numerically stable softmax over Lk, kept in f32.
    m = jnp.max(s, axis=-1, keepdims=True)
    p = jnp.exp(s - m)
    denom = jnp.sum(p, axis=-1, keepdims=True)
    if exact_div:
        attn = p / denom                               # exact: attn parity with torch
    else:
        attn = p * pl.reciprocal(denom, approx=True)   # EUP vrcp, y-only path

    # y = attn @ V ; probabilities cast to V's dtype before the MXU push.
    y = lax.dot_general(
        attn.astype(v.dtype), v,
        dimension_numbers=(((2,), (1,)), ((0,), (0,))),
        preferred_element_type=jnp.float32,
    )  # (bb, tq, dv)
    return attn, y


def _sdpa_kernel(q_ref, k_ref, v_ref, y_ref, attn_ref, *, inv_sqrt_dk, mxu_bf16):
    attn, y = _attention_block(q_ref[...], k_ref[...], v_ref[...],
                               inv_sqrt_dk=inv_sqrt_dk, mxu_bf16=mxu_bf16,
                               exact_div=True)
    attn_ref[...] = attn.astype(attn_ref.dtype)
    y_ref[...] = y.astype(y_ref.dtype)


def _sdpa_kernel_y_only(q_ref, k_ref, v_ref, y_ref, *, inv_sqrt_dk, mxu_bf16):
    _, y = _attention_block(q_ref[...], k_ref[...], v_ref[...],
                            inv_sqrt_dk=inv_sqrt_dk, mxu_bf16=mxu_bf16,
                            exact_div=False)
    y_ref[...] = y.astype(y_ref.dtype)


# ---------------------------------------------------------------------------
# Block sizing (hardware-aware VMEM accounting)
# ---------------------------------------------------------------------------

def _sublane(dtype):
    """Sublane packing for the dtype: 8 for f32, 16 for bf16, 32 for int8/fp8."""
    return max(8, 32 // jnp.dtype(dtype).itemsize)


def _vmem_capacity_bytes():
    try:
        return int(pltpu.get_tpu_info().vmem_capacity_bytes)
    except Exception:
        return 64 * 1024 * 1024  # conservative fallback (v7x per-core VMEM)


def _buffered_once_supported():
    """Whether pl.BlockSpec accepts pipeline_mode=pl.Buffered(1)."""
    try:
        pl.BlockSpec((8, 128), lambda i: (i, 0), pipeline_mode=pl.Buffered(1))
        return True
    except Exception:
        return False


def _footprint_bytes(bb, bq, Lk, dk, dv, itemsize, need_attn, kv_buffers):
    """VMEM bytes for one grid step, counting multi-buffering + f32 temps."""
    q_buf = 2 * bb * bq * dk * itemsize                       # Q block, double-buffered
    k_buf = kv_buffers * bb * Lk * dk * itemsize              # K block
    v_buf = kv_buffers * bb * Lk * dv * itemsize              # V block
    y_buf = 2 * bb * bq * dv * itemsize                       # y block, double-buffered
    a_buf = (2 * bb * bq * Lk * itemsize) if need_attn else 0  # attn block
    f32_tmp = bb * bq * (3 * Lk + dv) * 4                     # s, p, attn (f32) + y acc
    return q_buf + k_buf + v_buf + y_buf + a_buf + f32_tmp


def _select_blocks(B, Lq, Lk, dk, dv, dtype, budget, need_attn, kv_buffers):
    itemsize = jnp.dtype(dtype).itemsize
    sub = _sublane(dtype)

    # block_q candidates: sublane multiples that divide Lq, plus the full axis.
    cands = sorted({c for c in range(sub, min(Lq, 2048) + 1, sub) if Lq % c == 0}
                   | {Lq})

    def fits(bb, bq):
        return _footprint_bytes(bb, bq, Lk, dk, dv, itemsize,
                                need_attn, kv_buffers) <= budget

    # Largest block_q that fits with a single batch element (footprint is
    # monotone in block_q, so the last fitting candidate wins).
    block_q = cands[0]
    for c in cands:
        if fits(1, c):
            block_q = c

    # Pack batch elements per step to amortize per-step overhead.
    block_b = 1
    for bb in range(2, B + 1):
        if B % bb == 0 and fits(bb, block_q):
            block_b = bb

    # Megacore (v7x has 2 TCs): keep >= 2 grid steps when the problem allows.
    if (B // block_b) * (Lq // block_q) < 2:
        if B >= 2:
            bb = B // 2
            while B % bb:
                bb -= 1
            block_b = bb
        else:
            smaller = [c for c in cands if c < block_q]
            if smaller:
                block_q = smaller[-1]

    return block_b, block_q


# ---------------------------------------------------------------------------
# Public wrapper
# ---------------------------------------------------------------------------

def scaled_dot_product_attention(Q, K, V, d_k, *, need_attn=True, mxu_bf16=False):
    """Pallas TPU implementation of ScaledDotProductAttention.forward (eval).

    Returns (y, attn) when need_attn=True (module parity), else just y.
    """
    B, Lq, dk = Q.shape
    _, Lk, dv = V.shape
    assert K.shape == (B, Lk, dk), "K must be (B, Lk, d_k)"
    assert V.shape[0] == B and V.shape[1] == Lk

    itemsize = jnp.dtype(Q.dtype).itemsize

    # Hardware-derived VMEM budget: ~96 MiB on v5e/v6e (128 MiB), ~48 MiB on
    # v7x (64 MiB).  Leave headroom for compiler scratch when sizing blocks.
    capacity = _vmem_capacity_bytes()
    vmem_limit = int(capacity * 0.75)
    block_budget = int(vmem_limit * 0.85)

    use_buffered_kv = _buffered_once_supported()
    kv_buffers = 1 if use_buffered_kv else 2

    block_b, block_q = _select_blocks(B, Lq, Lk, dk, dv, Q.dtype,
                                      block_budget, need_attn, kv_buffers)

    def kv_spec(shape, index_map):
        if use_buffered_kv:
            # K/V index_map is constant across the inner q axis -> one buffer.
            return pl.BlockSpec(shape, index_map, pipeline_mode=pl.Buffered(1))
        return pl.BlockSpec(shape, index_map)

    in_specs = [
        pl.BlockSpec((block_b, block_q, dk), lambda b, q: (b, q, 0)),
        kv_spec((block_b, Lk, dk), lambda b, q: (b, 0, 0)),
        kv_spec((block_b, Lk, dv), lambda b, q: (b, 0, 0)),
    ]

    io_bytes = (Q.size + K.size + V.size + B * Lq * dv) * itemsize
    if need_attn:
        io_bytes += B * Lq * Lk * itemsize
    cost = pl.CostEstimate(
        flops=2 * B * Lq * Lk * (dk + dv),
        transcendentals=B * Lq * Lk,
        bytes_accessed=io_bytes,
    )

    inv_sqrt_dk = 1.0 / math.sqrt(d_k)

    if need_attn:
        kernel = functools.partial(_sdpa_kernel, inv_sqrt_dk=inv_sqrt_dk,
                                   mxu_bf16=mxu_bf16)
        out_shape = (
            jax.ShapeDtypeStruct((B, Lq, dv), Q.dtype),   # y
            jax.ShapeDtypeStruct((B, Lq, Lk), Q.dtype),   # attn (input dtype, like torch)
        )
        out_specs = [
            pl.BlockSpec((block_b, block_q, dv), lambda b, q: (b, q, 0)),
            pl.BlockSpec((block_b, block_q, Lk), lambda b, q: (b, q, 0)),
        ]
    else:
        kernel = functools.partial(_sdpa_kernel_y_only, inv_sqrt_dk=inv_sqrt_dk,
                                   mxu_bf16=mxu_bf16)
        out_shape = jax.ShapeDtypeStruct((B, Lq, dv), Q.dtype)
        out_specs = pl.BlockSpec((block_b, block_q, dv), lambda b, q: (b, q, 0))

    grid_spec = pltpu.PrefetchScalarGridSpec(
        num_scalar_prefetch=0,
        grid=(B // block_b, Lq // block_q),
        in_specs=in_specs,
        out_specs=out_specs,
    )

    return pl.pallas_call(
        kernel,
        out_shape=out_shape,
        grid_spec=grid_spec,
        cost_estimate=cost,
        compiler_params=pltpu.CompilerParams(
            dimension_semantics=("parallel", "parallel"),
            vmem_limit_bytes=vmem_limit,
        ),
    )(Q, K, V)


# ---------------------------------------------------------------------------
# Reference + self-test
# ---------------------------------------------------------------------------

def _reference(Q, K, V, d_k):
    s = jnp.einsum("bqd,bkd->bqk", Q, K,
                   precision=lax.Precision.HIGHEST) / math.sqrt(d_k)
    attn = jax.nn.softmax(s, axis=-1)
    y = jnp.einsum("bqk,bkd->bqd", attn, V, precision=lax.Precision.HIGHEST)
    return y, attn


if __name__ == "__main__":
    key = jax.random.PRNGKey(0)
    kq, kk, kv = jax.random.split(key, 3)

    B, Lq, Lk, d_k, d_v = 2, 8, 8, 32, 32
    Q = jax.random.normal(kq, (B, Lq, d_k), dtype=jnp.float32)
    K = jax.random.normal(kk, (B, Lk, d_k), dtype=jnp.float32)
    V = jax.random.normal(kv, (B, Lk, d_v), dtype=jnp.float32)

    y, attn = scaled_dot_product_attention(Q, K, V, d_k)
    jax.block_until_ready((y, attn))

    y_ref, attn_ref = _reference(Q, K, V, d_k)
    assert jnp.allclose(attn, attn_ref, atol=2e-3, rtol=2e-3), "attn mismatch"
    assert jnp.allclose(y, y_ref, atol=2e-3, rtol=2e-3), "y mismatch"

    # Exercise the y-only fast path as well (no attn HBM writeback).
    y_only = scaled_dot_product_attention(Q, K, V, d_k, need_attn=False)
    jax.block_until_ready(y_only)
    assert jnp.allclose(y_only, y_ref, atol=2e-3, rtol=2e-3), "y-only mismatch"

    print("KERNEL_OK")
</pallas_src>

<mosaic_0001>
module attributes {stable_mosaic.version = 11 : i64} {
  func.func @_sdpa_kernel(%arg0: i32, %arg1: i32, %arg2: memref<1x8x32xf32, #tpu.memory_space<vmem>>, %arg3: memref<1x8x32xf32, #tpu.memory_space<vmem>>, %arg4: memref<1x8x32xf32, #tpu.memory_space<vmem>>, %arg5: memref<1x8x32xf32, #tpu.memory_space<vmem>>, %arg6: memref<1x8x8xf32, #tpu.memory_space<vmem>>) attributes {dimension_semantics = [#tpu.dimension_semantics<parallel>, #tpu.dimension_semantics<parallel>], iteration_bounds = array<i64: 2, 1>, scalar_prefetch = 0 : i64, scratch_operands = 0 : i64, tpu.core_type = #tpu.core_type<tc>, window_params = [{transform_indices = @transform_0, window_bounds = array<i64: 1, 8, 32>}, {pipeline_mode = #tpu.pipeline_mode<synchronous>, transform_indices = @transform_1, window_bounds = array<i64: 1, 8, 32>}, {pipeline_mode = #tpu.pipeline_mode<synchronous>, transform_indices = @transform_2, window_bounds = array<i64: 1, 8, 32>}, {transform_indices = @transform_3, window_bounds = array<i64: 1, 8, 32>}, {transform_indices = @transform_4, window_bounds = array<i64: 1, 8, 8>}]} {
    %c0 = arith.constant 0 : index
    %c0_0 = arith.constant 0 : index
    %c0_1 = arith.constant 0 : index
    %0 = vector.load %arg2[%c0, %c0_0, %c0_1] : memref<1x8x32xf32, #tpu.memory_space<vmem>>, vector<1x8x32xf32>
    %c0_2 = arith.constant 0 : index
    %c0_3 = arith.constant 0 : index
    %c0_4 = arith.constant 0 : index
    %1 = vector.load %arg3[%c0_2, %c0_3, %c0_4] : memref<1x8x32xf32, #tpu.memory_space<vmem>>, vector<1x8x32xf32>
    %c0_5 = arith.constant 0 : index
    %c0_6 = arith.constant 0 : index
    %c0_7 = arith.constant 0 : index
    %2 = vector.load %arg4[%c0_5, %c0_6, %c0_7] : memref<1x8x32xf32, #tpu.memory_space<vmem>>, vector<1x8x32xf32>
    %cst = arith.constant dense<0.000000e+00> : vector<1x8x8xf32>
    %3 = tpu.matmul %0, %1, %cst {dimension_numbers = #tpu.dot_dimension_numbers<[2], [2], [1], [1], [0, 0, 0, 1, 1, 1], [0], [0]>} : vector<1x8x32xf32>, vector<1x8x32xf32>, vector<1x8x8xf32> -> vector<1x8x8xf32>
    %cst_8 = arith.constant 0.176776692 : f32
    %4 = vector.broadcast %cst_8 : f32 to vector<1x8x8xf32>
    %5 = arith.mulf %3, %4 : vector<1x8x8xf32>
    %cst_9 = arith.constant dense<0xFF800000> : vector<1x8xf32>
    %6 = vector.multi_reduction <maximumf>, %5, %cst_9 [2] : vector<1x8x8xf32> to vector<1x8xf32>
    %7 = vector.shape_cast %6 : vector<1x8xf32> to vector<1x8x1xf32>
    %8 = vector.broadcast %7 : vector<1x8x1xf32> to vector<1x8x8xf32>
    %9 = arith.subf %5, %8 : vector<1x8x8xf32>
    %10 = math.exp %9 : vector<1x8x8xf32>
    %cst_10 = arith.constant dense<0.000000e+00> : vector<1x8xf32>
    %11 = vector.multi_reduction <add>, %10, %cst_10 [2] : vector<1x8x8xf32> to vector<1x8xf32>
    %12 = vector.shape_cast %11 : vector<1x8xf32> to vector<1x8x1xf32>
    %13 = vector.broadcast %12 : vector<1x8x1xf32> to vector<1x8x8xf32>
    %14 = arith.divf %10, %13 : vector<1x8x8xf32>
    %cst_11 = arith.constant dense<0.000000e+00> : vector<1x8x32xf32>
    %15 = tpu.matmul %14, %2, %cst_11 {dimension_numbers = #tpu.dot_dimension_numbers<[2], [1], [1], [2], [0, 0, 0, 1, 1, 2], [0], [0]>} : vector<1x8x8xf32>, vector<1x8x32xf32>, vector<1x8x32xf32> -> vector<1x8x32xf32>
    %c0_12 = arith.constant 0 : index
    %c0_13 = arith.constant 0 : index
    %c0_14 = arith.constant 0 : index
    %16 = vector.load %arg6[%c0_12, %c0_13, %c0_14] : memref<1x8x8xf32, #tpu.memory_space<vmem>>, vector<1x8x8xf32>
    tpu.vector_store %arg6[%c0_12, %c0_13, %c0_14], %14 {strides = array<i32>} : memref<1x8x8xf32, #tpu.memory_space<vmem>>, vector<1x8x8xf32>,
    %c0_15 = arith.constant 0 : index
    %c0_16 = arith.constant 0 : index
    %c0_17 = arith.constant 0 : index
    %17 = vector.load %arg5[%c0_15, %c0_16, %c0_17] : memref<1x8x32xf32, #tpu.memory_space<vmem>>, vector<1x8x32xf32>
    tpu.vector_store %arg5[%c0_15, %c0_16, %c0_17], %15 {strides = array<i32>} : memref<1x8x32xf32, #tpu.memory_space<vmem>>, vector<1x8x32xf32>,
    return
  }
  func.func @transform_0(%arg0: i32, %arg1: i32) -> (i32, i32, i32) {
    %c0_i32 = arith.constant 0 : i32
    %c0_i32_0 = arith.constant 0 : i32
    return %arg0, %arg1, %c0_i32 : i32, i32, i32
  }
  func.func @transform_1(%arg0: i32, %arg1: i32) -> (i32, i32, i32) {
    %c0_i32 = arith.constant 0 : i32
    %c0_i32_0 = arith.constant 0 : i32
    %c0_i32_1 = arith.constant 0 : i32
    return %arg0, %c0_i32, %c0_i32_0 : i32, i32, i32
  }
  func.func @transform_2(%arg0: i32, %arg1: i32) -> (i32, i32, i32) {
    %c0_i32 = arith.constant 0 : i32
    %c0_i32_0 = arith.constant 0 : i32
    %c0_i32_1 = arith.constant 0 : i32
    return %arg0, %c0_i32, %c0_i32_0 : i32, i32, i32
  }
  func.func @transform_3(%arg0: i32, %arg1: i32) -> (i32, i32, i32) {
    %c0_i32 = arith.constant 0 : i32
    %c0_i32_0 = arith.constant 0 : i32
    return %arg0, %arg1, %c0_i32 : i32, i32, i32
  }
  func.func @transform_4(%arg0: i32, %arg1: i32) -> (i32, i32, i32) {
    %c0_i32 = arith.constant 0 : i32
    %c0_i32_0 = arith.constant 0 : i32
    return %arg0, %arg1, %c0_i32 : i32, i32, i32
  }
}

</mosaic_0001>

<bundles_post_ra>
// kernel: tpu_custom_call.1
= control target key start
LH: loop header
LB: loop body
LE: loop exit
PB: predicated region body
PF: predicated region fallthrough
CT: control target
= control target key end

     0   :  { %10 = vsyncpa [#allocation3], 0  ;;  %s1266_s0 = inlined_call_operand.hbm [shape: f32[2,8,32], index: 0, kind: input, shape index: {}]   ;;  %s1267_s1 = inlined_call_operand.hbm [shape: f32[2,8,32], index: 1, kind: input, shape index: {}]   ;;  %s1268_s2 = inlined_call_operand.hbm [shape: f32[2,8,32], index: 2, kind: input, shape index: {}]   ;;  %s1269_s3 = inlined_call_operand.hbm [shape: f32[2,8,32], index: 3, kind: output, shape index: {0}]   ;;  %s1270_s4 = inlined_call_operand.hbm [shape: f32[2,8,8], index: 4, kind: output, shape index: {1}]  }
   0x1   :  { %12 = vsyncpa [#allocation3 + $0x1], 0 }
   0x2   :  { %13 = vsyncpa [#allocation6], 0 }
   0x3   :  { %14 = vsyncpa [#allocation4], 0 }
   0x4   :  { %16 = vsyncpa [#allocation4 + $0x1], 0 }
   0x5   :  { %17 = vsyncpa [#allocation10], 0 }
   0x6   :  { %19 = vsyncpa [#allocation10 + $0x1], 0  ;;  %s983_s15 = smov 0   ;;  %s985_s16 = smov 0  }
   0x7   :  { %s987_s17 = smov 0   ;;  %s989_s18 = smov 0  }
   0x8   :  { %s991_s19 = smov 0   ;;  %s993_s20 = smov 0  }
   0x9 LB: > { %s620_s21 = sadd.s32 4294967295, %s949_s20   ;;  %s621_s22 = sadd.s32 4294967294, %s949_s20   ;;  %s949_s20 = sphi %s993_s20, %s25_s20   ;;  %s945_s19 = sphi %s991_s19, %s1290_s19   ;;  %s941_s18 = sphi %s989_s18, %s1289_s18   ;;  %s937_s17 = sphi %s987_s17, %s1288_s17   ;;  %s933_s16 = sphi %s985_s16, %s1287_s16   ;;  %s929_s15 = sphi %s983_s15, %s1286_s15  }
   0xa   : > { %p59_p0 = scmp.ne.s32.totalorder %s933_s16, %s929_s15  ;;  %p60_p1 = scmp.eq.s32.totalorder %s620_s21, 0 }
   0xb   : > { %p1015_p2 = scmp.eq.s32.totalorder %s620_s21, 1  ;;  %p143_p3 = scmp.eq.s32.totalorder %s621_s22, 1 }
   0xc   : > { %p1019_p4 = por %p60_p1, %p59_p0  ;;  %p622_p5 = scmp.ge.s32.totalorder %s949_s20, 1 }
   0xd   : > { %s1274_s23 = scalar_select %p1015_p2, 1, 0 }
   0xe   : > { %s1275_s24 = scalar_select %p1019_p4, 1, 0 }
   0xf   : > { %p1024_p6 = por %p143_p3, %p59_p0  ;;  %p178_p7 = scmp.lt.s32.totalorder %s949_s20, 3 }
  0x10   : > { %s1029_s26 = sshll.u32 %s941_s18, 7  ;;  %s951_s5 = smov [#allocation5]  }
  0x11   : > { %s1276_s25 = scalar_select %p1024_p6, 1, 0 }
  0x12   : > { %p1031_p8 = pnand %p622_p5, %p178_p7  ;;  %s1039_s30 = scalar_lea.hbm %s1267_s1, %s1029_s26 }
  0x13   : > { %s193_s6 = sshll.u32 %s951_s5, 4  ;;  %s1048_s9 = scalar_lea.hbm %s1268_s2, %s1029_s26  ;;  %s194_s6 = int_to_ptr.vmem [resolvable:$true] %s193_s6 }
  0x14   : > { %s1277_s27 = scalar_select %p1031_p8, 1, 0 }
  0x15   : > { %p665_p10 = pneg %p1031_p8  ;;  %s952_s11 = smov [#allocation7]  }
  0x16   : > { %s206_s12 = sshll.u32 %s952_s11, 4  ;;  %s741_s13 = scalar_lea.hbm %s1039_s30, 128  ;;  %s1056_s12 = int_to_ptr.vmem [resolvable:$true] %s206_s12 }
  0x17   : > { %p1052_p11 = pnand %p665_p10, %p1019_p4  ;;  %p742_p12 = scmp.ne.s32.totalorder %s1039_s30, %s741_s13 }
  0x18   : > { %s746_s21 = scalar_lea.hbm %s1267_s1, 256  ;;  %p747_p3 = scmp.lt.u32.totalorder %s1039_s30, %s1267_s1 }
  0x19   : > { %p743_p13 = pneg %p1052_p11  ;;  %p748_p5 = scmp.lt.u32.totalorder %s746_s21, %s741_s13 }
  0x1a   : > { %p750_p10 = scmp.lt.u32.totalorder %s741_s13, %s1039_s30 }
  0x1b   : > { %p744_p0 = pnand %p743_p13, %p742_p12  ;;  %p749_p7 = por %p748_p5, %p747_p3 }
  0x1d   : > { %p745_p1 = pneg %p744_p0  ;;  %p751_p9 = por %p750_p10, %p749_p7 }
  0x1f   : > { %p752_p6 = pnand %p751_p9, %p745_p1 }
  0x21   : > { %755 = shalt.err (!%p752_p6)
}
  0x22   : > { %s756_s29 = scalar_lea.vmem %s194_s6, 128  ;;  %p764_p8 = scmp.lt.s32.totalorder %s194_s6, %s194_s6 }
  0x23   : > { %p757_p4 = scmp.ne.s32.totalorder %s194_s6, %s756_s29  ;;  %p765_p2 = scmp.lt.s32.totalorder %s756_s29, %s756_s29 }
  0x25   : > { %p759_p12 = pnand %p757_p4, %p743_p13  ;;  %p766_p3 = por %p765_p2, %p764_p8 }
  0x27   : > { %p760_p0 = pneg %p759_p12 }
  0x29   : > { %p767_p5 = pnand %p766_p3, %p760_p0 }
  0x2b   : > { %770 = shalt.err (!%p767_p5)
}
  0x2c   : > { %668 = dma.hbm_to_vmem [thread:$0]  (!%p1052_p11), %s1039_s30, 128, %s194_s6, [#allocation6]  }
  0x2d   : > { %s771_s5 = scalar_lea.hbm %s1048_s9, 128  ;;  %s776_s11 = scalar_lea.hbm %s1268_s2, 256 }
  0x2e   : > { %p772_p6 = scmp.ne.s32.totalorder %s1048_s9, %s771_s5  ;;  %p777_p2 = scmp.lt.u32.totalorder %s1048_s9, %s1268_s2 }
  0x2f   : > { %p778_p8 = scmp.lt.u32.totalorder %s776_s11, %s771_s5  ;;  %p780_p7 = scmp.lt.u32.totalorder %s771_s5, %s1048_s9 }
  0x30   : > { %p774_p4 = pnand %p772_p6, %p743_p13 }
  0x31   : > { %p779_p1 = por %p778_p8, %p777_p2 }
  0x32   : > { %p775_p9 = pneg %p774_p4 }
  0x33   : > { %p781_p10 = por %p780_p7, %p779_p1 }
  0x35   : > { %p782_p12 = pnand %p781_p10, %p775_p9 }
  0x37   : > { %785 = shalt.err (!%p782_p12)
}
  0x38   : > { %s786_s30 = scalar_lea.vmem %s1056_s12, 128  ;;  %p794_p6 = scmp.lt.s32.totalorder %s1056_s12, %s1056_s12 }
  0x39   : > { %p787_p0 = scmp.ne.s32.totalorder %s1056_s12, %s786_s30  ;;  %p795_p4 = scmp.lt.s32.totalorder %s786_s30, %s786_s30 }
  0x3b   : > { %p789_p3 = pnand %p787_p0, %p743_p13  ;;  %p796_p2 = por %p795_p4, %p794_p6 }
  0x3d   : > { %p790_p5 = pneg %p789_p3 }
  0x3f   : > { %p797_p8 = pnand %p796_p2, %p790_p5 }
  0x41   : > { %800 = shalt.err (!%p797_p8)
}
  0x42   : > { %671 = dma.hbm_to_vmem [thread:$0]  (!%p1052_p11), %s1048_s9, 128, %s1056_s12, [#allocation6]  }
  0x43   : > { %s37_s6 = sadd.s32 1, %s945_s19  ;;  %s46_s18 = sadd.s32 1, %s937_s17 }
  0x44   : > { %p39_p13 = scmp.ge.s32.totalorder %s37_s6, 2  ;;  %p53_p9 = scmp.ne.s32.totalorder %s937_s17, %s933_s16 }
  0x45   : > { %p54_p1 = scmp.eq.s32.totalorder %s949_s20, 0  ;;  %p683_p7 = scmp.lt.s32.totalorder %s949_s20, 2 }
  0x46   : > { %s1292_s6 = smov (%p39_p13, %s37_s6), 0  ;;  %p1279_p12 = scmp.ne.s32.totalorder %s1274_s23, 0 }
  0x47   : > { %p55_p10 = por %p54_p1, %p53_p9  ;;  %s41_s21 = ssub.s32 %s945_s19, %s1292_s6 }
  0x48   : > { %p1113_p0 = por %p1279_p12, %p53_p9  ;;  %s217_s22 = sand.u32 1, %s937_s17  }
  0x49   : > { %p44_p3 = scmp.eq.s32.totalorder %s41_s21, 0  ;;  %s626_s9 = sshll.u32 %s217_s22, 3 }
  0x4a   : > { %s627_s12 = sshll.u32 %s945_s19, 7  ;;  %s221_s23 = scalar_lea.vmem [#allocation2], %s626_s9 }
  0x4b   : > { %s1122_s28 = scalar_select %p44_p3, %s937_s17, %s46_s18  }
  0x4c   : > { %s1127_s7 = scalar_lea.hbm %s1266_s0, %s627_s12  ;;  %s229_s8 = sshll.u32 %s221_s23, 4  ;;  %s1135_s8 = int_to_ptr.vmem [resolvable:$true] %s229_s8 }
  0x4d   : > { %p1131_p11 = pnand %p683_p7, %p55_p10  ;;  %s218_s13 = scalar_lea.sflag [#allocation3], %s217_s22 }
  0x4e   : > { %s801_s14 = scalar_lea.hbm %s1127_s7, 128  ;;  %s806_s21 = scalar_lea.hbm %s1266_s0, 256 }
  0x4f   : > { %p802_p5 = scmp.ne.s32.totalorder %s1127_s7, %s801_s14  ;;  %p803_p6 = pneg %p1131_p11 }
  0x50   : > { %p807_p8 = scmp.lt.u32.totalorder %s1127_s7, %s1266_s0  ;;  %p808_p13 = scmp.lt.u32.totalorder %s806_s21, %s801_s14 }
  0x51   : > { %p804_p4 = pnand %p803_p6, %p802_p5  ;;  %p810_p1 = scmp.lt.u32.totalorder %s801_s14, %s1127_s7 }
  0x52   : > { %p809_p9 = por %p808_p13, %p807_p8 }
  0x53   : > { %p805_p2 = pneg %p804_p4 }
  0x54   : > { %p811_p7 = por %p810_p1, %p809_p9 }
  0x56   : > { %p812_p10 = pnand %p811_p7, %p805_p2 }
  0x58   : > { %815 = shalt.err (!%p812_p10)
}
  0x59   : > { %s816_s22 = scalar_lea.vmem %s1135_s8, 128  ;;  %s953_s29 = smov [#allocation2]  }
  0x5a   : > { %p817_p12 = scmp.ne.s32.totalorder %s1135_s8, %s816_s22  ;;  %s821_s5 = sshll.u32 %s953_s29, 4  ;;  %s822_s5 = int_to_ptr.vmem [resolvable:$false] %s821_s5 }
  0x5b   : > { %s823_s23 = scalar_lea.vmem %s822_s5, 256  ;;  %p824_p4 = scmp.lt.s32.totalorder %s1135_s8, %s822_s5 }
  0x5c   : > { %p819_p3 = pnand %p817_p12, %p803_p6  ;;  %p825_p8 = scmp.lt.s32.totalorder %s823_s23, %s816_s22 }
  0x5e   : > { %p820_p5 = pneg %p819_p3  ;;  %p826_p13 = por %p825_p8, %p824_p4 }
  0x60   : > { %p827_p9 = pnand %p826_p13, %p820_p5 }
  0x62   : > { %830 = shalt.err (!%p827_p9)
}
  0x63   : > { %675 = dma.hbm_to_vmem [thread:$0]  (!%p1131_p11), %s1127_s7, 128, %s1135_s8, %s218_s13  }
  0x64   : > { %p1282_p2 = scmp.ne.s32.totalorder %s1277_s27, 0 }
  0x65   : > { %s1165_s14 = sand.u32 (!%p1282_p2), 1, %s933_s16   ;;  %p1283_p6 = scmp.ne.s32.totalorder (!%p1282_p2), %s1275_s24, 0 }
  0x66   : > { %238 = sbr.rel (%p1282_p2) target bundleno = 872 (0x368), region = 32  ;;  %s1168_s30 = sshll.u32 (!%p1282_p2), %s1165_s14, 3 }
  0x67   : > { %s241_s18 = scalar_lea.sflag (!%p1282_p2), [#allocation3], %s1165_s14  ;;  %s244_s21 = scalar_lea.vmem (!%p1282_p2), [#allocation2], %s1168_s30 }
  0x6d   : > { %912 = dma.done.wait (%p1283_p6), %s241_s18, 128  }
  0x6e   : > { %914 = vsyncadd (%p1283_p6), %s241_s18, 4294967168 }
  0x6f   : > { %916 = dma.done.wait (%p1283_p6), [#allocation6], 256  }
  0x70   : > { %918 = vsyncadd (%p1283_p6), [#allocation6], 4294967040  ;;  %v954_v0 = vmov 0.0   ;;  %vm955_vm0 = vmmov 0   ;;  %vm285_vm1 = vcmask 261120   ;;  %v283_v1 = vld [vmem:[#allocation5] sm:$0xff]  ;;  %s1191_s11 = scalar_lea.hbm %s1270_s4, %s1029_s26 }
  0x71   : > { %645 = vmatprep.subr.mxu0 %v954_v0  ;;  %647 = vmatprep.mubr.msk.f32.mxu0 %vm955_vm0, %v954_v0  ;;  %v282_v2 = vld [vmem:[%s244_s21] sm:$0xff]  ;;  %vm363_vm2 = vcmask 64512   ;;  %v284_v12 = vld [vmem:[#allocation7] sm:$0xff]  ;;  %s281_s24 = scalar_lea.vmem [#allocation9], %s1168_s30  ;;  %s456_s13 = scalar_lea.sflag [#allocation10], %s1165_s14 }
  0x72   : > { %650 = vmatprep.subr.mxu1 %v954_v0  ;;  %652 = vmatprep.mubr.msk.f32.mxu1 %vm955_vm0, %v954_v0  ;;  %s484_s27 = sshll.u32 %s281_s24, 4  ;;  %s956_s12 = smov [#allocation9]   ;;  %s485_s27 = int_to_ptr.vmem [resolvable:$true] %s484_s27 }
  0x73   : > { %646 = vmatpush3.xpose.msk.msra.mxu0 %vm285_vm1, %v283_v1  ;;  %651 = vmatpush3.msra.mxu1 %v284_v12  ;;  %s831_s9 = scalar_lea.vmem %s485_s27, 128  ;;  %s835_s22 = sshll.u32 %s956_s12, 4  ;;  %s836_s22 = int_to_ptr.vmem [resolvable:$false] %s835_s22 }
  0x74   : > { %p832_p11 = scmp.ne.s32.totalorder %s485_s27, %s831_s9  ;;  %s837_s29 = scalar_lea.vmem %s836_s22, 256 }
  0x75   : > { %p838_p10 = scmp.lt.s32.totalorder %s485_s27, %s836_s22  ;;  %p839_p12 = scmp.lt.s32.totalorder %s837_s29, %s831_s9 }
  0x76   : > { %648 = vmatmul.mubr.msk.f32.vlgmr.msra.gmra.mrb[0].mxu0 %vm285_vm1, %v282_v2  ;;  %p833_p1 = pnand %p832_p11, %p1113_p0 }
  0x77   : > { %p840_p3 = por %p839_p12, %p838_p10 }
  0x78   : > { %p834_p7 = pneg %p833_p1 }
  0x7a   : > { %p841_p5 = pnand %p840_p3, %p834_p7 }
 0x149   : > { %v358_v3 = vpop.f32.mrb[0].mxu0 }
 0x14a   : > { %v362_v4 = vmul.f32 0.17677669, %v358_v3  ;;  %v649_v5 = vpop.f32.mrb[1].mxu0 }
 0x14c   : > { %v364_v6 = vsel %vm363_vm2, %v362_v4, -inf }
 0x14d   : > { %365 = vmax.xlane.f32.xlu0 %v364_v6 }
 0x1da   : > { %v366_v7 = vpop.xlane.xlu0 %365 }
 0x1db   : > { %v367_v8 = vsub.f32 %v362_v4, %v366_v7 }
 0x1dd   : > { %v368_v9 = vmul.f32 1.442695, %v367_v8 }
 0x1df   : > { %737 = vpow2.f32 %v368_v9 }
 0x1e9   : > { %v738_v10 = vpop.eup %737 }
 0x1ea   : > { %v370_v11 = vsel %vm363_vm2, %v738_v10, 0.0 }
 0x1eb   : > { %371 = vadd.xlane.f32.xlu0 %v370_v11 }
 0x278   : > { %v372_v13 = vpop.xlane.xlu0 %371 }
 0x279   : > { %739 = vrcp.f32 %v372_v13 }
 0x283   : > { %v740_v14 = vpop.eup %739 }
 0x284   : > { %v374_v15 = vmul.f32 %v740_v14, %v738_v10 }
 0x286   : > { %653 = vmatmul.mubr.msk.f32.vlgmr.msra.gmra.mrb[0].mxu1 %vm363_vm2, %v374_v15  ;;  %448 = vst.msk [vmem:[%s281_s24] sm:$0xff] %vm363_vm2, %v374_v15 }
 0x287   : > { %844 = shalt.err (!%p841_p5)
}
 0x288   : > { %s845_s5 = scalar_lea.hbm %s1191_s11, 128  ;;  %s849_s21 = scalar_lea.hbm %s1270_s4, 256 }
 0x289   : > { %p846_p4 = scmp.ne.s32.totalorder %s1191_s11, %s845_s5  ;;  %p850_p9 = scmp.lt.u32.totalorder %s1191_s11, %s1270_s4 }
 0x28a   : > { %p851_p2 = scmp.lt.u32.totalorder %s849_s21, %s845_s5  ;;  %p853_p11 = scmp.lt.u32.totalorder %s845_s5, %s1191_s11 }
 0x28b   : > { %p847_p8 = pnand %p846_p4, %p1113_p0 }
 0x28c   : > { %p852_p6 = por %p851_p2, %p850_p9 }
 0x28d   : > { %p848_p13 = pneg %p847_p8 }
 0x28e   : > { %p854_p1 = por %p853_p11, %p852_p6 }
 0x290   : > { %p855_p7 = pnand %p854_p1, %p848_p13 }
 0x292   : > { %858 = shalt.err (!%p855_p7)
}
 0x293   : > { %662 = dma.vmem_to_hbm [thread:$0]  (%p1113_p0), %s485_s27, 128, %s1191_s11, %s456_s13  }
 0x294   : > { %s274_s8 = scalar_lea.vmem [#allocation8], %s1168_s30  ;;  %s1216_s29 = scalar_lea.hbm %s1269_s3, %s1029_s26 }
 0x295   : > { %s470_s9 = sshll.u32 %s274_s8, 4  ;;  %s451_s5 = scalar_lea.sflag [#allocation4], %s1165_s14  ;;  %s1218_s9 = int_to_ptr.vmem [resolvable:$true] %s470_s9 }
 0x296   : > { %s859_s23 = scalar_lea.vmem %s1218_s9, 128  ;;  %s957_s30 = smov [#allocation8]  }
 0x297   : > { %p860_p10 = scmp.ne.s32.totalorder %s1218_s9, %s859_s23  ;;  %s863_s27 = sshll.u32 %s957_s30, 4  ;;  %s864_s27 = int_to_ptr.vmem [resolvable:$false] %s863_s27 }
 0x298   : > { %s865_s26 = scalar_lea.vmem %s864_s27, 256  ;;  %p866_p5 = scmp.lt.s32.totalorder %s1218_s9, %s864_s27 }
 0x299   : > { %p861_p12 = pnand %p860_p10, %p1113_p0  ;;  %p867_p4 = scmp.lt.s32.totalorder %s865_s26, %s859_s23 }
 0x29b   : > { %p862_p3 = pneg %p861_p12  ;;  %p868_p8 = por %p867_p4, %p866_p5 }
 0x29d   : > { %p869_p13 = pnand %p868_p8, %p862_p3 }
 0x359   : > { %v444_v16 = vpop.f32.mrb[0].mxu1 }
 0x35a   : > { %449 = vst.msk [vmem:[%s274_s8] sm:$0xff] %vm285_vm1, %v444_v16  ;;  %v654_v17 = vpop.f32.mrb[1].mxu1 }
 0x35b   : > { %872 = shalt.err (!%p869_p13)
}
 0x35c   : > { %s873_s14 = scalar_lea.hbm %s1216_s29, 128  ;;  %s877_s18 = scalar_lea.hbm %s1269_s3, 256 }
 0x35d   : > { %p874_p9 = scmp.ne.s32.totalorder %s1216_s29, %s873_s14  ;;  %p878_p11 = scmp.lt.u32.totalorder %s1216_s29, %s1269_s3 }
 0x35e   : > { %p879_p1 = scmp.lt.u32.totalorder %s877_s18, %s873_s14  ;;  %p881_p10 = scmp.lt.u32.totalorder %s873_s14, %s1216_s29 }
 0x35f   : > { %p875_p2 = pnand %p874_p9, %p1113_p0 }
 0x360   : > { %p880_p7 = por %p879_p1, %p878_p11 }
 0x361   : > { %p876_p6 = pneg %p875_p2 }
 0x362   : > { %p882_p12 = por %p881_p10, %p880_p7 }
 0x364   : > { %p883_p3 = pnand %p882_p12, %p876_p6 }
 0x366   : > { %886 = shalt.err (!%p883_p3)
}
 0x367   : > { %661 = dma.vmem_to_hbm [thread:$0]  (%p1113_p0), %s1218_s9, 128, %s1216_s29, %s451_s5  }
 0x368 PF: > { %s496_s7 = sand.u32 1, %s929_s15   ;;  %p1284_p5 = scmp.ne.s32.totalorder %s1276_s25, 0 }
 0x369   : > { %p1285_p4 = scmp.ge.s32.totalorder %s949_s20, 2  ;;  %s497_s8 = scalar_lea.sflag [#allocation4], %s496_s7 }
 0x36b   : > { %p677_p8 = pnand %p1285_p4, %p1284_p5 }
 0x36d   : > { %920 = dma.done.wait (!%p677_p8), %s497_s8, 128  }
 0x36e   : > { %922 = vsyncadd (!%p677_p8), %s497_s8, 4294967168  ;;  %s506_s12 = scalar_lea.sflag [#allocation10], %s496_s7 }
 0x36f   : > { %924 = dma.done.wait (!%p677_p8), %s506_s12, 128  }
 0x370   : > { %926 = vsyncadd (!%p677_p8), %s506_s12, 4294967168  ;;  %s25_s20 = sadd.s32 1, %s949_s20   ;;  %s1286_s15 = smov %s933_s16 }
 0x371   : > { %p22_p13 = scmp.ge.s32.totalorder %s25_s20, 4   ;;  %s1287_s16 = smov %s937_s17 }
 0x372   : > { %s1288_s17 = smov %s1122_s28  ;;  %s1289_s18 = smov %s945_s19 }
 0x373   : > { %s1290_s19 = smov %s1292_s6  ;;  %24 = sbr.rel (!%p22_p13) target bundleno = 9 (0x9), region = 104 }
 0x37a   :  { %511 = vsyncpa [#allocation3], 1 }
 0x37b   :  { %513 = vsyncpa [#allocation3 + $0x1], 1 }
 0x37c   :  { %514 = vsyncpa [#allocation6], 1 }
 0x37d   :  { %515 = vsyncpa [#allocation4], 1 }
 0x37e   :  { %517 = vsyncpa [#allocation4 + $0x1], 1 }
 0x37f   :  { %518 = vsyncpa [#allocation10], 1 }
 0x380   :  { %520 = vsyncpa [#allocation10 + $0x1], 1 }

</bundles_post_ra>
